<compile_context>
chip_gen: v7x
topology: tpu7x:2x2x1
jax: 0.10.0
libtpu: 0.0.40
codegen_flags: <defaults>
</compile_context>

<pallas_src>
import functools

import jax
import jax.numpy as jnp
from jax import lax
from jax.experimental import pallas as pl
from jax.experimental.pallas import tpu as pltpu

BN_EPS = 1e-5
HID = 128            # lane-padded hidden width (true hidden width is 64)
W23_ROWS = 64        # shared slab rows for the side-by-side fc2 / fc3 weights
OUT_LANE = 64        # lane holding the critic output (fc3 column in the shared block)
BN_ROWS = 8          # sublane rows holding the packed gamma/beta parameters
NUM_PASSES = 4       # stats(l1), stats(l2), stats(l3), normalize+write
SMALL_BATCH_MAX = 2048   # padded rows; above this the 4-pass tiled kernel is used
DEFAULT_TILE_B = 1024    # batch-tile rows for the tiled kernel


def _round_up(n, m):
    return ((n + m - 1) // m) * m


def _vmem_limit_bytes():
    cap = None
    try:
        cap = getattr(pltpu.get_tpu_info(), "vmem_capacity_bytes", None)
    except Exception:
        cap = None
    if not cap:
        cap = 64 * 1024 * 1024  # assume the smallest generation (v7x) if unknown
    # leave headroom for compiler scratch / double buffering; cap at ~100 MiB
    return int(max(32 * 1024 * 1024,
                   min(cap - 16 * 1024 * 1024, 100 * 1024 * 1024)))


# ----------------------------------------------------------------------------
# In-kernel helpers (traced).
# ----------------------------------------------------------------------------
def _row_mask(tile_rows, row_offset, n_valid):
    """[1, tile_rows] f32 mask: 1.0 for rows that are real batch rows."""
    lanes = lax.broadcasted_iota(jnp.int32, (1, tile_rows), 1)
    return ((row_offset + lanes) < n_valid).astype(jnp.float32)


def _masked_stats(h, mask_row):
    """One MXU op: [1,tile] @ [tile,256] -> [1,256] = [sum(h) | sum(h*h)]."""
    return jnp.dot(mask_row, jnp.concatenate([h, h * h], axis=1),
                   preferred_element_type=jnp.float32)


def _scale_shift(stats, gamma, beta, inv_n):
    """Fold BN (mean-sub, rsqrt, gamma, beta) into y = h*scale + shift."""
    mu = stats[:, :HID] * inv_n
    ex2 = stats[:, HID:] * inv_n
    var = jnp.maximum(ex2 - mu * mu, 0.0)
    scale = lax.rsqrt(var + BN_EPS) * gamma
    return scale, beta - mu * scale


def _unpack_params(p_ref, in_pad):
    w1 = p_ref[0:in_pad, :]                                        # [in_pad,128]
    w23 = p_ref[in_pad:in_pad + W23_ROWS, :]                       # [64,128]
    bn = p_ref[in_pad + W23_ROWS:in_pad + W23_ROWS + BN_ROWS, :]   # [8,128]
    return (w1, w23,
            bn[0:1, :], bn[1:2, :],   # gamma1, beta1
            bn[2:3, :], bn[3:4, :],   # gamma2, beta2
            bn[4:5, :], bn[5:6, :])   # gamma3, beta3 (live in lane OUT_LANE)


# ----------------------------------------------------------------------------
# Small-batch path: fused, gridless (whole batch resident in VMEM).
# ----------------------------------------------------------------------------
def _small_kernel(x_ref, p_ref, o_ref, *, in_pad, n_valid):
    x = x_ref[...]                                    # [Bp, in_pad]
    bp = x.shape[0]
    w1, w23, g1, b1, g2, b2, g3, b3 = _unpack_params(p_ref, in_pad)

    inv_n = 1.0 / float(n_valid)
    mask = _row_mask(bp, 0, n_valid)                  # padded rows excluded from stats

    # fc1 -> bn1 -> relu   (Linear bias omitted: cancelled by full-batch BN mean)
    h1 = jnp.dot(x, w1, preferred_element_type=jnp.float32)
    s1, t1 = _scale_shift(_masked_stats(h1, mask), g1, b1, inv_n)
    a1 = jnp.maximum(h1 * s1 + t1, 0.0)

    # fc2 -> bn2 -> relu   (shared weight block; junk in lane 64 is zeroed by gamma2=0)
    h2 = jnp.dot(a1[:, :W23_ROWS], w23, preferred_element_type=jnp.float32)
    s2, t2 = _scale_shift(_masked_stats(h2, mask), g2, b2, inv_n)
    a2 = jnp.maximum(h2 * s2 + t2, 0.0)

    # fc3 -> bn3 (no relu); critic value lands in lane OUT_LANE
    h3 = jnp.dot(a2[:, :W23_ROWS], w23, preferred_element_type=jnp.float32)
    s3, t3 = _scale_shift(_masked_stats(h3, mask), g3, b3, inv_n)
    y = h3 * s3 + t3

    o_ref[...] = y[:, OUT_LANE:OUT_LANE + 1].astype(o_ref.dtype)   # [Bp, 1]


# ----------------------------------------------------------------------------
# Large-batch path: 4-pass batch-tiled kernel; grid = (pass, tile).
#   pass 0: accumulate layer-1 stats        pass 2: accumulate layer-3 stats
#   pass 1: accumulate layer-2 stats        pass 3: normalize + write output
# Recompute (3 small matmuls/row) is far cheaper than storing intermediates.
# ----------------------------------------------------------------------------
def _tiled_kernel(x_ref, p_ref, o_ref, s1_ref, s2_ref, s3_ref, *,
                  in_pad, n_valid, tile_b):
    p = pl.program_id(0)        # pass index
    j = pl.program_id(1)        # batch-tile index

    w1, w23, g1, b1, g2, b2, g3, b3 = _unpack_params(p_ref, in_pad)
    inv_n = 1.0 / float(n_valid)
    mask = _row_mask(tile_b, j * tile_b, n_valid)
    x = x_ref[...]              # [tile_b, in_pad]

    @pl.when(jnp.logical_and(p == 0, j == 0))
    def _():
        s1_ref[...] = jnp.zeros_like(s1_ref)
        s2_ref[...] = jnp.zeros_like(s2_ref)
        s3_ref[...] = jnp.zeros_like(s3_ref)

    h1 = jnp.dot(x, w1, preferred_element_type=jnp.float32)

    @pl.when(p == 0)
    def _():
        s1_ref[...] += _masked_stats(h1, mask)

    @pl.when(p >= 1)
    def _():
        sc1, sh1 = _scale_shift(s1_ref[...], g1, b1, inv_n)
        a1 = jnp.maximum(h1 * sc1 + sh1, 0.0)
        h2 = jnp.dot(a1[:, :W23_ROWS], w23, preferred_element_type=jnp.float32)

        @pl.when(p == 1)
        def _():
            s2_ref[...] += _masked_stats(h2, mask)

        @pl.when(p >= 2)
        def _():
            sc2, sh2 = _scale_shift(s2_ref[...], g2, b2, inv_n)
            a2 = jnp.maximum(h2 * sc2 + sh2, 0.0)
            h3 = jnp.dot(a2[:, :W23_ROWS], w23, preferred_element_type=jnp.float32)

            @pl.when(p == 2)
            def _():
                s3_ref[...] += _masked_stats(h3, mask)

            @pl.when(p == 3)
            def _():
                sc3, sh3 = _scale_shift(s3_ref[...], g3, b3, inv_n)
                y = h3 * sc3 + sh3
                o_ref[...] = y[:, OUT_LANE:OUT_LANE + 1].astype(o_ref.dtype)


# ----------------------------------------------------------------------------
# Wrapper.
# ----------------------------------------------------------------------------
def policy_critic_forward(x, packed_params, *, tile_b=DEFAULT_TILE_B,
                          force_tiled=False):
    """x: [B, input_dim] f32.  packed_params: slab from pack_params()."""
    B, d = x.shape
    in_pad = packed_params.shape[0] - (W23_ROWS + BN_ROWS)
    x = x.astype(jnp.float32)
    if d < in_pad:                        # pad features to the slab's row count
        x = jnp.pad(x, ((0, 0), (0, in_pad - d)))

    vmem_limit = _vmem_limit_bytes()
    use_small = (B <= SMALL_BATCH_MAX) and not force_tiled

    if use_small:
        b_pad = _round_up(max(B, 8), 8)
        if b_pad != B:
            x = jnp.pad(x, ((0, b_pad - B), (0, 0)))
        vmem = pl.BlockSpec(memory_space=pltpu.MemorySpace.VMEM)
        out = pl.pallas_call(
            functools.partial(_small_kernel, in_pad=in_pad, n_valid=B),
            out_shape=jax.ShapeDtypeStruct((b_pad, 1), jnp.float32),
            in_specs=[vmem, vmem],
            out_specs=vmem,
            compiler_params=pltpu.CompilerParams(vmem_limit_bytes=vmem_limit),
        )(x, packed_params)
    else:
        tile_b = max(8, _round_up(min(tile_b, max(B, 8)), 8))
        b_pad = _round_up(max(B, 8), tile_b)
        if b_pad != B:
            x = jnp.pad(x, ((0, b_pad - B), (0, 0)))
        num_tiles = b_pad // tile_b
        p_rows = packed_params.shape[0]
        out = pl.pallas_call(
            functools.partial(_tiled_kernel, in_pad=in_pad, n_valid=B,
                              tile_b=tile_b),
            out_shape=jax.ShapeDtypeStruct((b_pad, 1), jnp.float32),
            grid_spec=pltpu.PrefetchScalarGridSpec(
                num_scalar_prefetch=0,
                grid=(NUM_PASSES, num_tiles),
                in_specs=[
                    pl.BlockSpec((tile_b, in_pad), lambda p, j: (j, 0)),
                    pl.BlockSpec((p_rows, HID), lambda p, j: (0, 0)),  # resident slab
                ],
                out_specs=pl.BlockSpec((tile_b, 1), lambda p, j: (j, 0)),
                scratch_shapes=[pltpu.VMEM((1, 2 * HID), jnp.float32)] * 3,
            ),
            compiler_params=pltpu.CompilerParams(
                dimension_semantics=("arbitrary", "arbitrary"),
                vmem_limit_bytes=vmem_limit,
            ),
        )(x, packed_params)
    return out[:B]                         # drop padded rows


# ----------------------------------------------------------------------------
# Parameters.
# ----------------------------------------------------------------------------
def init_params(key, input_dim):
    """PyTorch-style init: Linear uniform(-1/sqrt(fan_in), 1/sqrt(fan_in));
    BN gamma=1, beta=0.  Weights stored as [in, out]."""
    def linear(key, fan_in, fan_out):
        kw, kb = jax.random.split(key)
        bound = 1.0 / float(fan_in) ** 0.5
        w = jax.random.uniform(kw, (fan_in, fan_out), jnp.float32, -bound, bound)
        b = jax.random.uniform(kb, (fan_out,), jnp.float32, -bound, bound)
        return w, b

    k1, k2, k3 = jax.random.split(key, 3)
    w1, b1 = linear(k1, input_dim, 64)
    w2, b2 = linear(k2, 64, 64)
    w3, b3 = linear(k3, 64, 1)
    return {
        "w1": w1, "b1": b1,
        "g1": jnp.ones((64,), jnp.float32), "be1": jnp.zeros((64,), jnp.float32),
        "w2": w2, "b2": b2,
        "g2": jnp.ones((64,), jnp.float32), "be2": jnp.zeros((64,), jnp.float32),
        "w3": w3, "b3": b3,
        "g3": jnp.ones((1,), jnp.float32), "be3": jnp.zeros((1,), jnp.float32),
    }


def pack_params(p):
    """Pack weights + BN affine params (NOT the Linear biases — they cancel
    under full-batch training-mode BN) into one [in_pad + 72, 128] f32 slab.
    fc2 occupies lanes 0:63 and fc3 lane 64 of 64 shared rows."""
    input_dim = p["w1"].shape[0]
    in_pad = _round_up(input_dim, 8)
    w1 = jnp.zeros((in_pad, HID), jnp.float32).at[:input_dim, :64].set(p["w1"])
    w23 = jnp.zeros((W23_ROWS, HID), jnp.float32)
    w23 = w23.at[:, :64].set(p["w2"]).at[:, OUT_LANE:OUT_LANE + 1].set(p["w3"])
    bn = jnp.zeros((BN_ROWS, HID), jnp.float32)
    bn = bn.at[0, :64].set(p["g1"]).at[1, :64].set(p["be1"])
    bn = bn.at[2, :64].set(p["g2"]).at[3, :64].set(p["be2"])
    bn = bn.at[4, OUT_LANE].set(p["g3"][0]).at[5, OUT_LANE].set(p["be3"][0])
    return jnp.concatenate([w1, w23, bn], axis=0)


def reference_forward(x, p):
    """Pure-JAX reference matching the PyTorch module (includes the Linear
    biases, which the kernel omits — they cancel under BN mean subtraction)."""
    def bn(h, g, b):
        mu = jnp.mean(h, axis=0, keepdims=True)
        var = jnp.mean((h - mu) ** 2, axis=0, keepdims=True)
        return (h - mu) * lax.rsqrt(var + BN_EPS) * g + b

    h = jnp.maximum(bn(x @ p["w1"] + p["b1"], p["g1"], p["be1"]), 0.0)
    h = jnp.maximum(bn(h @ p["w2"] + p["b2"], p["g2"], p["be2"]), 0.0)
    return bn(h @ p["w3"] + p["b3"], p["g3"], p["be3"])


if __name__ == "__main__":
    input_dim = 32
    key = jax.random.PRNGKey(0)
    kx1, kx2, kp = jax.random.split(key, 3)
    params = init_params(kp, input_dim)
    packed = pack_params(params)

    # 1) Small-batch fused path (B=10, not a multiple of 8 -> exercises masking).
    x1 = jax.random.normal(kx1, (10, input_dim), jnp.float32)
    out1 = jax.block_until_ready(policy_critic_forward(x1, packed))
    ref1 = reference_forward(x1, params)
    assert out1.shape == (10, 1)
    assert jnp.allclose(out1, ref1, atol=1e-4, rtol=1e-4), (out1, ref1)

    # 2) Batch-tiled 4-pass path, forced with a tiny tile so the test stays small
    #    (B=176 is not a multiple of tile_b=64 -> exercises cross-tile stats + masking).
    x2 = jax.random.normal(kx2, (176, input_dim), jnp.float32)
    out2 = jax.block_until_ready(
        policy_critic_forward(x2, packed, tile_b=64, force_tiled=True))
    ref2 = reference_forward(x2, params)
    assert out2.shape == (176, 1)
    assert jnp.allclose(out2, ref2, atol=1e-4, rtol=1e-4), (out2, ref2)

    print("KERNEL_OK")
</pallas_src>

<mosaic_0001>
module attributes {stable_mosaic.version = 11 : i64} {
  func.func @_small_kernel(%arg0: memref<16x32xf32, #tpu.memory_space<vmem>>, %arg1: memref<104x128xf32, #tpu.memory_space<vmem>>, %arg2: memref<16x1xf32, #tpu.memory_space<vmem>>) attributes {dimension_semantics = [], scalar_prefetch = 0 : i64, scratch_operands = 0 : i64, tpu.core_type = #tpu.core_type<tc>} {
    %c0 = arith.constant 0 : index
    %c0_0 = arith.constant 0 : index
    %0 = vector.load %arg0[%c0, %c0_0] : memref<16x32xf32, #tpu.memory_space<vmem>>, vector<16x32xf32>
    %c0_1 = arith.constant 0 : index
    %c0_2 = arith.constant 0 : index
    %1 = vector.load %arg1[%c0_1, %c0_2] : memref<104x128xf32, #tpu.memory_space<vmem>>, vector<32x128xf32>
    %c32 = arith.constant 32 : index
    %c0_3 = arith.constant 0 : index
    %2 = vector.load %arg1[%c32, %c0_3] : memref<104x128xf32, #tpu.memory_space<vmem>>, vector<64x128xf32>
    %c96 = arith.constant 96 : index
    %c0_4 = arith.constant 0 : index
    %3 = vector.load %arg1[%c96, %c0_4] : memref<104x128xf32, #tpu.memory_space<vmem>>, vector<8x128xf32>
    %4 = vector.extract_strided_slice %3 {offsets = [0, 0], sizes = [1, 128], strides = [1, 1]} : vector<8x128xf32> to vector<1x128xf32>
    %5 = vector.extract_strided_slice %3 {offsets = [1, 0], sizes = [1, 128], strides = [1, 1]} : vector<8x128xf32> to vector<1x128xf32>
    %6 = vector.extract_strided_slice %3 {offsets = [2, 0], sizes = [1, 128], strides = [1, 1]} : vector<8x128xf32> to vector<1x128xf32>
    %7 = vector.extract_strided_slice %3 {offsets = [3, 0], sizes = [1, 128], strides = [1, 1]} : vector<8x128xf32> to vector<1x128xf32>
    %8 = vector.extract_strided_slice %3 {offsets = [4, 0], sizes = [1, 128], strides = [1, 1]} : vector<8x128xf32> to vector<1x128xf32>
    %9 = vector.extract_strided_slice %3 {offsets = [5, 0], sizes = [1, 128], strides = [1, 1]} : vector<8x128xf32> to vector<1x128xf32>
    %10 = tpu.iota {dimensions = array<i32: 1>} : vector<1x16xi32>
    %c0_i32 = arith.constant 0 : i32
    %11 = vector.broadcast %c0_i32 : i32 to vector<1x16xi32>
    %12 = arith.addi %11, %10 : vector<1x16xi32>
    %c10_i32 = arith.constant 10 : i32
    %13 = vector.broadcast %c10_i32 : i32 to vector<1x16xi32>
    %14 = arith.cmpi slt, %12, %13 : vector<1x16xi32>
    %15 = arith.extui %14 : vector<1x16xi1> to vector<1x16xi32>
    %16 = arith.sitofp %15 : vector<1x16xi32> to vector<1x16xf32>
    %cst = arith.constant dense<0.000000e+00> : vector<16x128xf32>
    %17 = tpu.matmul %0, %1, %cst {dimension_numbers = #tpu.dot_dimension_numbers<[1], [0], [0], [1], [0, 0, 1, 1], [], []>} : vector<16x32xf32>, vector<32x128xf32>, vector<16x128xf32> -> vector<16x128xf32>
    %18 = arith.mulf %17, %17 : vector<16x128xf32>
    %19 = tpu.concatenate %17, %18 in 1 : vector<16x128xf32>, vector<16x128xf32> -> vector<16x256xf32>
    %cst_5 = arith.constant dense<0.000000e+00> : vector<1x256xf32>
    %20 = tpu.matmul %16, %19, %cst_5 {dimension_numbers = #tpu.dot_dimension_numbers<[1], [0], [0], [1], [0, 0, 1, 1], [], []>} : vector<1x16xf32>, vector<16x256xf32>, vector<1x256xf32> -> vector<1x256xf32>
    %21 = vector.extract_strided_slice %20 {offsets = [0, 0], sizes = [1, 128], strides = [1, 1]} : vector<1x256xf32> to vector<1x128xf32>
    %cst_6 = arith.constant 1.000000e-01 : f32
    %22 = vector.broadcast %cst_6 : f32 to vector<1x128xf32>
    %23 = arith.mulf %21, %22 : vector<1x128xf32>
    %24 = vector.extract_strided_slice %20 {offsets = [0, 128], sizes = [1, 128], strides = [1, 1]} : vector<1x256xf32> to vector<1x128xf32>
    %cst_7 = arith.constant 1.000000e-01 : f32
    %25 = vector.broadcast %cst_7 : f32 to vector<1x128xf32>
    %26 = arith.mulf %24, %25 : vector<1x128xf32>
    %27 = arith.mulf %23, %23 : vector<1x128xf32>
    %28 = arith.subf %26, %27 : vector<1x128xf32>
    %cst_8 = arith.constant 0.000000e+00 : f32
    %29 = vector.broadcast %cst_8 : f32 to vector<1x128xf32>
    %30 = arith.maximumf %28, %29 : vector<1x128xf32>
    %cst_9 = arith.constant 9.99999974E-6 : f32
    %31 = vector.broadcast %cst_9 : f32 to vector<1x128xf32>
    %32 = arith.addf %30, %31 : vector<1x128xf32>
    %33 = math.rsqrt %32 : vector<1x128xf32>
    %34 = arith.mulf %33, %4 : vector<1x128xf32>
    %35 = arith.mulf %23, %34 : vector<1x128xf32>
    %36 = arith.subf %5, %35 : vector<1x128xf32>
    %37 = vector.broadcast %34 : vector<1x128xf32> to vector<16x128xf32>
    %38 = arith.mulf %17, %37 : vector<16x128xf32>
    %39 = vector.broadcast %36 : vector<1x128xf32> to vector<16x128xf32>
    %40 = arith.addf %38, %39 : vector<16x128xf32>
    %cst_10 = arith.constant 0.000000e+00 : f32
    %41 = vector.broadcast %cst_10 : f32 to vector<16x128xf32>
    %42 = arith.maximumf %40, %41 : vector<16x128xf32>
    %43 = vector.extract_strided_slice %42 {offsets = [0, 0], sizes = [16, 64], strides = [1, 1]} : vector<16x128xf32> to vector<16x64xf32>
    %cst_11 = arith.constant dense<0.000000e+00> : vector<16x128xf32>
    %44 = tpu.matmul %43, %2, %cst_11 {dimension_numbers = #tpu.dot_dimension_numbers<[1], [0], [0], [1], [0, 0, 1, 1], [], []>} : vector<16x64xf32>, vector<64x128xf32>, vector<16x128xf32> -> vector<16x128xf32>
    %45 = arith.mulf %44, %44 : vector<16x128xf32>
    %46 = tpu.concatenate %44, %45 in 1 : vector<16x128xf32>, vector<16x128xf32> -> vector<16x256xf32>
    %cst_12 = arith.constant dense<0.000000e+00> : vector<1x256xf32>
    %47 = tpu.matmul %16, %46, %cst_12 {dimension_numbers = #tpu.dot_dimension_numbers<[1], [0], [0], [1], [0, 0, 1, 1], [], []>} : vector<1x16xf32>, vector<16x256xf32>, vector<1x256xf32> -> vector<1x256xf32>
    %48 = vector.extract_strided_slice %47 {offsets = [0, 0], sizes = [1, 128], strides = [1, 1]} : vector<1x256xf32> to vector<1x128xf32>
    %cst_13 = arith.constant 1.000000e-01 : f32
    %49 = vector.broadcast %cst_13 : f32 to vector<1x128xf32>
    %50 = arith.mulf %48, %49 : vector<1x128xf32>
    %51 = vector.extract_strided_slice %47 {offsets = [0, 128], sizes = [1, 128], strides = [1, 1]} : vector<1x256xf32> to vector<1x128xf32>
    %cst_14 = arith.constant 1.000000e-01 : f32
    %52 = vector.broadcast %cst_14 : f32 to vector<1x128xf32>
    %53 = arith.mulf %51, %52 : vector<1x128xf32>
    %54 = arith.mulf %50, %50 : vector<1x128xf32>
    %55 = arith.subf %53, %54 : vector<1x128xf32>
    %cst_15 = arith.constant 0.000000e+00 : f32
    %56 = vector.broadcast %cst_15 : f32 to vector<1x128xf32>
    %57 = arith.maximumf %55, %56 : vector<1x128xf32>
    %cst_16 = arith.constant 9.99999974E-6 : f32
    %58 = vector.broadcast %cst_16 : f32 to vector<1x128xf32>
    %59 = arith.addf %57, %58 : vector<1x128xf32>
    %60 = math.rsqrt %59 : vector<1x128xf32>
    %61 = arith.mulf %60, %6 : vector<1x128xf32>
    %62 = arith.mulf %50, %61 : vector<1x128xf32>
    %63 = arith.subf %7, %62 : vector<1x128xf32>
    %64 = vector.broadcast %61 : vector<1x128xf32> to vector<16x128xf32>
    %65 = arith.mulf %44, %64 : vector<16x128xf32>
    %66 = vector.broadcast %63 : vector<1x128xf32> to vector<16x128xf32>
    %67 = arith.addf %65, %66 : vector<16x128xf32>
    %cst_17 = arith.constant 0.000000e+00 : f32
    %68 = vector.broadcast %cst_17 : f32 to vector<16x128xf32>
    %69 = arith.maximumf %67, %68 : vector<16x128xf32>
    %70 = vector.extract_strided_slice %69 {offsets = [0, 0], sizes = [16, 64], strides = [1, 1]} : vector<16x128xf32> to vector<16x64xf32>
    %cst_18 = arith.constant dense<0.000000e+00> : vector<16x128xf32>
    %71 = tpu.matmul %70, %2, %cst_18 {dimension_numbers = #tpu.dot_dimension_numbers<[1], [0], [0], [1], [0, 0, 1, 1], [], []>} : vector<16x64xf32>, vector<64x128xf32>, vector<16x128xf32> -> vector<16x128xf32>
    %72 = arith.mulf %71, %71 : vector<16x128xf32>
    %73 = tpu.concatenate %71, %72 in 1 : vector<16x128xf32>, vector<16x128xf32> -> vector<16x256xf32>
    %cst_19 = arith.constant dense<0.000000e+00> : vector<1x256xf32>
    %74 = tpu.matmul %16, %73, %cst_19 {dimension_numbers = #tpu.dot_dimension_numbers<[1], [0], [0], [1], [0, 0, 1, 1], [], []>} : vector<1x16xf32>, vector<16x256xf32>, vector<1x256xf32> -> vector<1x256xf32>
    %75 = vector.extract_strided_slice %74 {offsets = [0, 0], sizes = [1, 128], strides = [1, 1]} : vector<1x256xf32> to vector<1x128xf32>
    %cst_20 = arith.constant 1.000000e-01 : f32
    %76 = vector.broadcast %cst_20 : f32 to vector<1x128xf32>
    %77 = arith.mulf %75, %76 : vector<1x128xf32>
    %78 = vector.extract_strided_slice %74 {offsets = [0, 128], sizes = [1, 128], strides = [1, 1]} : vector<1x256xf32> to vector<1x128xf32>
    %cst_21 = arith.constant 1.000000e-01 : f32
    %79 = vector.broadcast %cst_21 : f32 to vector<1x128xf32>
    %80 = arith.mulf %78, %79 : vector<1x128xf32>
    %81 = arith.mulf %77, %77 : vector<1x128xf32>
    %82 = arith.subf %80, %81 : vector<1x128xf32>
    %cst_22 = arith.constant 0.000000e+00 : f32
    %83 = vector.broadcast %cst_22 : f32 to vector<1x128xf32>
    %84 = arith.maximumf %82, %83 : vector<1x128xf32>
    %cst_23 = arith.constant 9.99999974E-6 : f32
    %85 = vector.broadcast %cst_23 : f32 to vector<1x128xf32>
    %86 = arith.addf %84, %85 : vector<1x128xf32>
    %87 = math.rsqrt %86 : vector<1x128xf32>
    %88 = arith.mulf %87, %8 : vector<1x128xf32>
    %89 = arith.mulf %77, %88 : vector<1x128xf32>
    %90 = arith.subf %9, %89 : vector<1x128xf32>
    %91 = vector.broadcast %88 : vector<1x128xf32> to vector<16x128xf32>
    %92 = arith.mulf %71, %91 : vector<16x128xf32>
    %93 = vector.broadcast %90 : vector<1x128xf32> to vector<16x128xf32>
    %94 = arith.addf %92, %93 : vector<16x128xf32>
    %95 = vector.extract_strided_slice %94 {offsets = [0, 64], sizes = [16, 1], strides = [1, 1]} : vector<16x128xf32> to vector<16x1xf32>
    %c0_24 = arith.constant 0 : index
    %c0_25 = arith.constant 0 : index
    %96 = vector.load %arg2[%c0_24, %c0_25] : memref<16x1xf32, #tpu.memory_space<vmem>>, vector<16x1xf32>
    tpu.vector_store %arg2[%c0_24, %c0_25], %95 {strides = array<i32>} : memref<16x1xf32, #tpu.memory_space<vmem>>, vector<16x1xf32>,
    return
  }
}

</mosaic_0001>

<bundles_post_ra>
// kernel: tpu_custom_call.1
= control target key start
LH: loop header
LB: loop body
LE: loop exit
PB: predicated region body
PF: predicated region fallthrough
CT: control target
= control target key end

     0   :  { %7 = vsyncpa [#allocation3], 0  ;;  %s911_s0 = inlined_call_operand.hbm [shape: f32[16,32], index: 0, kind: input, shape index: {}]   ;;  %s912_s1 = inlined_call_operand.hbm [shape: f32[104,128], index: 1, kind: input, shape index: {}]   ;;  %s913_s2 = inlined_call_operand.vmem [shape: f32[16,1], index: 2, kind: output, shape index: {}]  }
   0x1   :  { %8 = vsyncpa [#allocation5], 0  ;;  %s825_s9 = smov [#allocation2]   ;;  %s777_s13 = scalar_lea.hbm %s911_s0, 256 }
   0x2   :  { %s14_s10 = sshll.u32 %s825_s9, 4  ;;  %p778_p0 = scmp.ne.s32.totalorder %s911_s0, %s777_s13  ;;  %s15_s10 = int_to_ptr.vmem [resolvable:$true] %s14_s10 }
   0x3   :  { %p781_p1 = scmp.lt.u32.totalorder %s777_s13, %s911_s0 }
   0x5   :  { %p783_p2 = pnand %p781_p1, %p778_p0 }
   0x7   :  { %786 = shalt.err (!%p783_p2)
}
   0x8   :  { %s787_s18 = scalar_lea.vmem %s15_s10, 256  ;;  %p792_p4 = scmp.lt.s32.totalorder %s15_s10, %s15_s10 }
   0x9   :  { %p788_p3 = scmp.ne.s32.totalorder %s15_s10, %s787_s18  ;;  %p793_p5 = scmp.lt.s32.totalorder %s787_s18, %s787_s18 }
   0xb   :  { %p794_p6 = por %p793_p5, %p792_p4 }
   0xd   :  { %p795_p7 = pnand %p794_p6, %p788_p3 }
   0xf   :  { %798 = shalt.err (!%p795_p7)
}
  0x10   :  { %s826_s19 = smov 128   ;;  %s827_s20 = smov 8  }
  0x11   :  { %20 = dma.hbm_to_vmem [thread:$0]  %s911_s0, 256, %s15_s10, [#allocation3], %s826_s19, %s826_s19, %s827_s20  }
  0x12   :  { %s828_s23 = smov [#allocation4]   ;;  %s799_s27 = scalar_lea.hbm %s912_s1, 1664 }
  0x13   :  { %s26_s24 = sshll.u32 %s828_s23, 4  ;;  %p800_p8 = scmp.ne.s32.totalorder %s912_s1, %s799_s27  ;;  %s27_s24 = int_to_ptr.vmem [resolvable:$true] %s26_s24 }
  0x14   :  { %p803_p9 = scmp.lt.u32.totalorder %s799_s27, %s912_s1 }
  0x16   :  { %p805_p10 = pnand %p803_p9, %p800_p8 }
  0x18   :  { %808 = shalt.err (!%p805_p10)
}
  0x19   :  { %s809_s4 = scalar_lea.vmem %s27_s24, 1664  ;;  %p814_p12 = scmp.lt.s32.totalorder %s27_s24, %s27_s24 }
  0x1a   :  { %p810_p11 = scmp.ne.s32.totalorder %s27_s24, %s809_s4  ;;  %p815_p13 = scmp.lt.s32.totalorder %s809_s4, %s809_s4 }
  0x1c   :  { %p816_p0 = por %p815_p13, %p814_p12 }
  0x1e   :  { %p817_p1 = pnand %p816_p0, %p810_p11 }
  0x20   :  { %820 = shalt.err (!%p817_p1)
}
  0x21   :  { %32 = dma.hbm_to_vmem [thread:$0]  %s912_s1, 1664, %s27_s24, [#allocation5], %s826_s19, %s826_s19, %s827_s20  }
  0x22   :  { %821 = dma.done.wait [#allocation3], 256  }
  0x23   :  { %822 = vsyncadd [#allocation3], 4294967040 }
  0x24   :  { %823 = dma.done.wait [#allocation5], 1664  }
  0x25   :  { %824 = vsyncadd [#allocation5], 4294965632  ;;  %vm59_vm0 = vcmask 261120   ;;  %v41_v0 = vld [vmem:[#allocation4] sm:$0xff]  ;;  %v42_v1 = vld [vmem:[#allocation4 + $0x8] sm:$0xff]  ;;  %v829_v8 = vmov 0.0   ;;  %v54_v9 = vlaneseq }
  0x26   :  { %v43_v2 = vld [vmem:[#allocation4 + $0x10] sm:$0xff]  ;;  %v713_v3 = vpack.c.bf16 %v42_v1, %v41_v0  ;;  %v44_v4 = vld [vmem:[#allocation4 + $0x18] sm:$0xff]  ;;  %211 = vmatprep.mubr.f32.mxu1 %v829_v8  ;;  %vm143_vm2 = vcmask 130048   ;;  %v45_v18 = vld [vmem:[#allocation4 + $0x20] sm:$0xff]  ;;  %vm245_vm3 = vcmask 523264   ;;  %s830_s1 = smov 64  }
  0x27   :  { %v39_v5 = vld [vmem:[#allocation2] sm:$0xff]  ;;  %v717_v6 = vpack.c.bf16 %v44_v4, %v43_v2  ;;  %v40_v7 = vld [vmem:[#allocation2 + $0x8] sm:$0xff]  ;;  %v55_v11 = vand.u32 127, %v54_v9  ;;  %v46_v19 = vld [vmem:[#allocation4 + $0x28] sm:$0xff]  ;;  %v877_v38 = vshrl.u32 %v54_v9, 7  ;;  %vm619_vm4 = vcmask 7168  }
  0x28   :  { %672 = vmatprep.mubr.msk.f32.mxu0 %vm59_vm0, %v39_v5  ;;  %714 = vmatprep.subr.bf16.mxu0 %v713_v3  ;;  %v47_v20 = vld [vmem:[#allocation4 + $0x30] sm:$0xff]  ;;  %v725_v21 = vpack.c.bf16 %v46_v19, %v45_v18  ;;  %v48_v22 = vld [vmem:[#allocation4 + $0x38] sm:$0xff]  ;;  %v49_v24 = vld [vmem:[#allocation4 + $0x40] sm:$0xff] }
  0x29   :  { %716 = vmatpush3.bf16.msra.mxu0 %v713_v3  ;;  %vm56_vm1 = vcmp.lt.s32.totalorder %v55_v11, 10  ;;  %v729_v23 = vpack.c.bf16 %v48_v22, %v47_v20  ;;  %v50_v25 = vld [vmem:[#allocation4 + $0x48] sm:$0xff]  ;;  %v51_v27 = vld [vmem:[#allocation4 + $0x50] sm:$0xff]  ;;  %v52_v28 = vld [vmem:[#allocation4 + $0x58] sm:$0xff]  ;;  %v882_v40 = vsub.s32 0, %v877_v38  ;;  %v239_v48 = vsub.s32 1, %v877_v38 }
  0x2a   :  { %718 = vmatprep.subr.bf16.mxu0 %v717_v6  ;;  %v873_v17 = vsel %vm56_vm1, 1.0, %v829_v8  ;;  %v733_v26 = vpack.c.bf16 %v50_v25, %v49_v24  ;;  %v737_v29 = vpack.c.bf16 %v52_v28, %v51_v27  ;;  %v879_v39 = vld [vmem:[#allocation4 + $0x60] sm:$0xff] }
  0x2b   :  { %v408_v5 = vrot.slane %v879_v39, 2 }
  0x2d   :  { %720 = vmatpush3.bf16.msra.mxu0 %v717_v6 }
  0x30   :  { %673 = vmatmul.mubr.msk.f32.vlgmr.msra.gmra.mrb[0].mxu0 %vm59_vm0, %v40_v7 }
  0x31   :  { %393 = vmatprep.mubr.f32.mxu0 %v829_v8 }
 0x103   :  { %v674_v10 = vpop.f32.mrb[0].mxu0 }
 0x104   :  { %v132_v12 = vpop.f32.mrb[1].mxu0  ;;  %v142_v13 = vmul.f32 %v674_v10, %v674_v10 }
 0x105   :  { %v141_v14 = vmul.f32 %v132_v12, %v132_v12  ;;  %v723_v15 = vpack.c.bf16 %v674_v10, %v132_v12 }
 0x107   :  { %v721_v16 = vpack.c.bf16 %v142_v13, %v141_v14  ;;  %v424_v13 = vsub.s32 3, %v877_v38 }
 0x109   :  { %722 = vmatprep.subr.bf16.mxu1 %v721_v16 }
 0x10a   :  { %724 = vmatpush1.bf16.msra.mxu1 %v723_v15 }
 0x10b   :  { %726 = vmatprep.subr.bf16.mxu1 %v725_v21 }
 0x10d   :  { %631 = vmatmul.mubr.msk.f32.vlgmr.msra.gmra.mrb[0].mxu1 %vm143_vm2, %v873_v17 }
 0x10e   :  { %728 = vmatpush3.bf16.msra.mxu1 %v725_v21 }
 0x10f   :  { %730 = vmatprep.subr.bf16.mxu1 %v729_v23 }
 0x112   :  { %732 = vmatpush3.bf16.msra.mxu1 %v729_v23 }
 0x113   :  { %734 = vmatprep.subr.bf16.mxu1 %v733_v26 }
 0x116   :  { %736 = vmatpush3.bf16.msra.mxu1 %v733_v26 }
 0x117   :  { %738 = vmatprep.subr.bf16.mxu1 %v737_v29 }
 0x11a   :  { %740 = vmatpush3.bf16.msra.mxu1 %v737_v29 }
 0x1e0   :  { %v213_v30 = vpop.f32.mrb[0].mxu1 }
 0x1e1   :  { %v218_v31 = vmul.f32 0.1, %v213_v30  ;;  %v215_v32 = vpop.f32.mrb[1].mxu1 }
 0x1e2   :  { %v219_v33 = vmul.f32 0.1, %v215_v32 }
 0x1e3   :  { %v220_v34 = vmul.f32 %v218_v31, %v218_v31 }
 0x1e5   :  { %v221_v35 = vsub.f32 %v219_v33, %v220_v34 }
 0x1e7   :  { %v222_v36 = vmax.f32 %v221_v35, 0.0  ;;  %v591_v35 = vrot.slane %v879_v39, 4 }
 0x1e9   :  { %v223_v37 = vadd.f32 1e-05, %v222_v36 }
 0x1eb   :  { %771 = vrsqrt.f32 %v223_v37 }
 0x1f5   :  { %v772_v41 = vpop.eup %771 }
 0x1f6   :  { %v225_v42 = vmul.f32 %v772_v41, %v879_v39 }
 0x1f8   :  { %v226_v43 = vmul.f32 %v225_v42, %v218_v31  ;;  %v234_v44 = vrot.slane %v225_v42, %v882_v40 }
 0x1fa   :  { %v228_v45 = vrot.slane %v226_v43, 7  ;;  %v235_v46 = vmul.f32 %v234_v44, %v132_v12  ;;  %v236_v47 = vmul.f32 %v674_v10, %v234_v44 }
 0x1fc   :  { %v230_v49 = vsub.f32 %v879_v39, %v228_v45 }
 0x1fe   :  { %v240_v50 = vrot.slane %v230_v49, %v239_v48 }
 0x200   :  { %v241_v51 = vadd.f32 %v240_v50, %v235_v46  ;;  %v242_v52 = vadd.f32 %v240_v50, %v236_v47 }
 0x202   :  { %v243_v53 = vmax.f32 %v241_v51, 0.0  ;;  %v244_v54 = vmax.f32 %v242_v52, 0.0 }
 0x204   :  { %691 = vmatprep.mubr.msk.f32.mxu1 %vm245_vm3, %v243_v53 }
 0x205   :  { %692 = vmatmul.mubr.msk.f32.vlgmr.msra.gmra.mrb[2].mxu1 %vm245_vm3, %v244_v54 }
 0x206   :  { %577 = vmatprep.mubr.f32.mxu1 %v829_v8 }
 0x2d8   :  { %v693_v55 = vpop.f32.mrb[2].mxu1 }
 0x2d9   :  { %v328_v56 = vmul.f32 %v693_v55, %v693_v55  ;;  %v318_v57 = vpop.f32.mrb[3].mxu1 }
 0x2da   :  { %v327_v58 = vmul.f32 %v318_v57, %v318_v57  ;;  %v743_v59 = vpack.c.bf16 %v693_v55, %v318_v57 }
 0x2dc   :  { %v741_v60 = vpack.c.bf16 %v328_v56, %v327_v58 }
 0x2de   :  { %742 = vmatprep.subr.bf16.mxu0 %v741_v60 }
 0x2df   :  { %744 = vmatpush1.bf16.msra.mxu0 %v743_v59 }
 0x2e0   :  { %746 = vmatprep.subr.bf16.mxu0 %v725_v21 }
 0x2e2   :  { %634 = vmatmul.mubr.msk.f32.vlgmr.msra.gmra.mrb[2].mxu0 %vm143_vm2, %v873_v17 }
 0x2e3   :  { %748 = vmatpush3.bf16.msra.mxu0 %v725_v21 }
 0x2e4   :  { %750 = vmatprep.subr.bf16.mxu0 %v729_v23 }
 0x2e7   :  { %752 = vmatpush3.bf16.msra.mxu0 %v729_v23 }
 0x2e8   :  { %754 = vmatprep.subr.bf16.mxu0 %v733_v26 }
 0x2eb   :  { %756 = vmatpush3.bf16.msra.mxu0 %v733_v26 }
 0x2ec   :  { %758 = vmatprep.subr.bf16.mxu0 %v737_v29 }
 0x2ef   :  { %760 = vmatpush3.bf16.msra.mxu0 %v737_v29 }
 0x3b5   :  { %v395_v61 = vpop.f32.mrb[2].mxu0 }
 0x3b6   :  { %v400_v62 = vmul.f32 0.1, %v395_v61  ;;  %v397_v63 = vpop.f32.mrb[3].mxu0 }
 0x3b7   :  { %v401_v0 = vmul.f32 0.1, %v397_v63 }
 0x3b8   :  { %v402_v1 = vmul.f32 %v400_v62, %v400_v62 }
 0x3ba   :  { %v403_v2 = vsub.f32 %v401_v0, %v402_v1 }
 0x3bc   :  { %v404_v3 = vmax.f32 %v403_v2, 0.0 }
 0x3be   :  { %v405_v4 = vadd.f32 1e-05, %v404_v3 }
 0x3c0   :  { %773 = vrsqrt.f32 %v405_v4 }
 0x3ca   :  { %v774_v6 = vpop.eup %773 }
 0x3cb   :  { %v410_v7 = vmul.f32 %v774_v6, %v408_v5 }
 0x3cd   :  { %v411_v8 = vmul.f32 %v410_v7, %v400_v62  ;;  %v419_v9 = vrot.slane %v410_v7, %v882_v40 }
 0x3cf   :  { %v413_v10 = vrot.slane %v411_v8, 5  ;;  %v420_v11 = vmul.f32 %v419_v9, %v318_v57  ;;  %v421_v12 = vmul.f32 %v693_v55, %v419_v9 }
 0x3d1   :  { %v415_v14 = vsub.f32 %v879_v39, %v413_v10 }
 0x3d3   :  { %v425_v15 = vrot.slane %v415_v14, %v424_v13 }
 0x3d5   :  { %v426_v16 = vadd.f32 %v425_v15, %v420_v11  ;;  %v427_v18 = vadd.f32 %v425_v15, %v421_v12 }
 0x3d7   :  { %v428_v19 = vmax.f32 %v426_v16, 0.0  ;;  %v429_v20 = vmax.f32 %v427_v18, 0.0 }
 0x3d9   :  { %710 = vmatprep.mubr.msk.f32.mxu0 %vm245_vm3, %v428_v19 }
 0x3da   :  { %711 = vmatmul.mubr.msk.f32.vlgmr.msra.gmra.mrb[4].mxu0 %vm245_vm3, %v429_v20 }
 0x4ad   :  { %v712_v21 = vpop.f32.mrb[4].mxu0 }
 0x4ae   :  { %v512_v22 = vmul.f32 %v712_v21, %v712_v21  ;;  %v502_v23 = vpop.f32.mrb[5].mxu0 }
 0x4af   :  { %v511_v24 = vmul.f32 %v502_v23, %v502_v23  ;;  %v763_v25 = vpack.c.bf16 %v712_v21, %v502_v23 }
 0x4b1   :  { %v761_v26 = vpack.c.bf16 %v512_v22, %v511_v24 }
 0x4b3   :  { %762 = vmatprep.subr.bf16.mxu1 %v761_v26 }
 0x4b4   :  { %764 = vmatpush1.bf16.msra.mxu1 %v763_v25 }
 0x4b7   :  { %637 = vmatmul.mubr.msk.f32.vlgmr.msra.gmra.mrb[4].mxu1 %vm143_vm2, %v873_v17  ;;  %v607_v17 = vsub.s32 5, %v877_v38 }
 0x58a   :  { %v579_v27 = vpop.f32.mrb[4].mxu1 }
 0x58b   :  { %v584_v28 = vmul.f32 0.1, %v579_v27  ;;  %v581_v29 = vpop.f32.mrb[5].mxu1 }
 0x58c   :  { %v585_v30 = vmul.f32 0.1, %v581_v29 }
 0x58d   :  { %v586_v31 = vmul.f32 %v584_v28, %v584_v28 }
 0x58f   :  { %v587_v32 = vsub.f32 %v585_v30, %v586_v31 }
 0x591   :  { %v588_v33 = vmax.f32 %v587_v32, 0.0 }
 0x593   :  { %v589_v34 = vadd.f32 1e-05, %v588_v33 }
 0x595   :  { %775 = vrsqrt.f32 %v589_v34 }
 0x59f   :  { %v776_v36 = vpop.eup %775 }
 0x5a0   :  { %v593_v37 = vmul.f32 %v776_v36, %v591_v35 }
 0x5a2   :  { %v594_v41 = vmul.f32 %v593_v37, %v584_v28  ;;  %v602_v42 = vrot.slane %v593_v37, %v882_v40 }
 0x5a4   :  { %v596_v43 = vrot.slane %v594_v41, 3  ;;  %v603_v44 = vmul.f32 %v602_v42, %v502_v23  ;;  %v604_v45 = vmul.f32 %v712_v21, %v602_v42 }
 0x5a6   :  { %v598_v46 = vsub.f32 %v879_v39, %v596_v43 }
 0x5a8   :  { %v608_v47 = vrot.slane %v598_v46, %v607_v17 }
 0x5aa   :  { %v609_v48 = vadd.f32 %v608_v47, %v603_v44  ;;  %v610_v49 = vadd.f32 %v608_v47, %v604_v45 }
 0x5ac   :  { %613 = vrot.lane.b32.xlu0 %v609_v48, %s830_s1 }
 0x5b0   :  { %615 = vrot.lane.b32.xlu0 %v610_v49, %s830_s1 }
 0x61e   :  { %v614_v50 = vpop.permute.xlu0 %613 }
 0x61f   :  { %620 = vst.msk [vmem:[%s913_s2] sm:$0xff] %vm619_vm4, %v614_v50 }
 0x622   :  { %v616_v40 = vpop.permute.xlu0 %615 }
 0x623   :  { %621 = vst.msk [vmem:[%s913_s2 + $0x8] sm:$0xff] %vm619_vm4, %v616_v40 }
 0x624   :  { %626 = vsyncpa [#allocation3], 1 }
 0x625   :  { %627 = vsyncpa [#allocation5], 1 }

</bundles_post_ra>
